<compile_context>
chip_gen: v5e
topology: v5e:2x2
jax: 0.10.0
libtpu: 0.0.40
codegen_flags: <defaults>
</compile_context>

<pallas_src>
import jax
import jax.numpy as jnp
from jax.experimental import pallas as pl
from jax.experimental.pallas import tpu as pltpu


def _round_up(x, m):
    return (x + m - 1) // m * m


def _cdiv(a, b):
    return -(-a // b)


def _choose_batch_tiling(B, tile_b_max):
    """Pick (tile_b, B_pad).

    tile_b is always a multiple of 16 (bf16 sublane packing); we aim for >= 3
    grid steps when the batch allows it (enables DMA double-buffer overlap and
    v7x megacore sharding) and prefer tile sizes that divide the 16-rounded
    batch exactly (zero padded rows / no wasted compute-writeback).
    """
    B_min = _round_up(max(B, 1), 16)
    cap = max(16, (min(tile_b_max, B_min) // 16) * 16)
    target_tiles = min(3, B_min // 16)
    if target_tiles > 1:
        cap = max(16, min(cap, (B_min // target_tiles) // 16 * 16))
    # Largest 16-multiple tile <= cap that divides B_min exactly.
    for t in range(cap, 15, -16):
        if B_min % t == 0:
            return t, B_min
    # Otherwise accept a padded last tile.
    return cap, _round_up(B_min, cap)


def _choose_tile_n(H_pad, O_pad, max_slab_bytes=8 << 20):
    """Tile width for the fused head-output axis.

    Keeps the resident bf16 head-weight block to a few MiB so large head slabs
    still fit v7x's 64 MiB VMEM; a single step (tile_n == O_pad) when small.
    """
    if H_pad * O_pad * 2 <= max_slab_bytes:
        return O_pad
    tile_n = (max_slab_bytes // (H_pad * 2)) // 128 * 128
    return int(min(max(tile_n, 128), O_pad))


def pack_mlp_head_params(w1, bn_scale, bn_shift, head_params):
    """One-time packing of weights into lane-dense, MXU-ready slabs.

    Call once outside the hot path and reuse the result for every forward
    (these packs are separate XLA ops and would otherwise dominate small-B calls).

    head_params: dict[name -> (w (H, O_k), b (1, O_k))]
    """
    names = tuple(head_params.keys())
    IN, H = w1.shape
    out_dims = tuple(head_params[k][0].shape[1] for k in names)
    sum_o = sum(out_dims)

    H_pad = _round_up(H, 128)
    O_pad = _round_up(sum_o, 128)
    tile_n = _choose_tile_n(H_pad, O_pad)
    O_pad = _round_up(O_pad, tile_n)

    # Fold the BatchNorm scale into W1 (static fold), pad hidden dim, cast bf16.
    w1_folded = (w1 * bn_scale).astype(jnp.float32)                      # (IN, H)
    w1_p = (jnp.zeros((IN, H_pad), jnp.float32)
            .at[:, :H].set(w1_folded).astype(jnp.bfloat16))
    shift_p = jnp.zeros((1, H_pad), jnp.float32).at[:, :H].set(bn_shift)

    # Concatenate all head weights/biases along the output axis, pad, cast bf16.
    w_cat = jnp.concatenate([head_params[k][0] for k in names], axis=1)  # (H, sum_o)
    b_cat = jnp.concatenate([head_params[k][1] for k in names], axis=1)  # (1, sum_o)
    wh_p = (jnp.zeros((H_pad, O_pad), jnp.float32)
            .at[:H, :sum_o].set(w_cat).astype(jnp.bfloat16))
    bh_p = jnp.zeros((1, O_pad), jnp.float32).at[:, :sum_o].set(b_cat)

    return dict(names=names, out_dims=out_dims, H_pad=H_pad, O_pad=O_pad,
                tile_n=tile_n, w1=w1_p, shift=shift_p, wh=wh_p, bh=bh_p)


def _multi_out_mlp_head_kernel(x_ref, w1_ref, shift_ref, wh_ref, bh_ref,
                               out_ref, h_ref):
    """h = SiLU(x @ W1' + shift) computed once per batch tile (j == 0), kept in
    bf16 VMEM scratch; out tile = h @ W_heads[:, j] + b_heads[:, j]."""
    @pl.when(pl.program_id(1) == 0)
    def _():
        xb = x_ref[...].astype(jnp.bfloat16)                 # cast on VPU, no wrapper copy
        h = jnp.dot(xb, w1_ref[...], preferred_element_type=jnp.float32)
        h = h + shift_ref[...]                               # folded BN (inference) shift
        h = h * jax.nn.sigmoid(h)                            # SiLU (EUP sigmoid + VPU mul)
        # Dropout(p=0.0) == identity.
        h_ref[...] = h.astype(jnp.bfloat16)
    o = jnp.dot(h_ref[...], wh_ref[...], preferred_element_type=jnp.float32)
    out_ref[...] = (o + bh_ref[...]).astype(out_ref.dtype)


def multi_out_mlp_head(x, packed, *, tile_b_max=512, out_dtype=None):
    """x: (B, IN). packed: result of pack_mlp_head_params. Returns dict[name -> (B, O_k)].

    tile_b_max: raise to 1024-2048 on v5e/v6e (128 MiB VMEM) for large B.
    out_dtype:  pass jnp.bfloat16 to halve output writeback bytes (recommended on v5e).
    """
    B, IN = x.shape
    names, out_dims = packed["names"], packed["out_dims"]
    H_pad, O_pad, tile_n = packed["H_pad"], packed["O_pad"], packed["tile_n"]
    w1_p, shift_p, wh_p, bh_p = packed["w1"], packed["shift"], packed["wh"], packed["bh"]
    assert w1_p.shape[0] == IN
    out_dtype = x.dtype if out_dtype is None else out_dtype

    tile_b, B_pad = _choose_batch_tiling(B, tile_b_max)
    # No wrapper-side cast/copy of x; pad rows only if the tiling needs it.
    x_p = x if B_pad == B else jnp.pad(x, ((0, B_pad - B), (0, 0)))

    n_b = B_pad // tile_b
    n_o = O_pad // tile_n
    grid = (n_b, n_o)

    x_itemsize = jnp.dtype(x.dtype).itemsize
    out_itemsize = jnp.dtype(out_dtype).itemsize
    weight_bytes = (w1_p.size * 2 + wh_p.size * 2
                    + (shift_p.size + bh_p.size) * 4)

    # Right-size the VMEM request: double-buffered x/out tiles + weights (count
    # double-buffered as worst case) + hidden intermediates + slack, capped at
    # 48 MiB so we never claim all of v7x's 64 MiB physical VMEM per core.
    vmem_need = (2 * tile_b * IN * x_itemsize
                 + 2 * tile_b * tile_n * out_itemsize
                 + 2 * weight_bytes
                 + tile_b * H_pad * (4 + 2)        # f32 h + bf16 scratch
                 + tile_b * tile_n * 4)            # f32 o accumulator
    vmem_limit = min(max(int(vmem_need * 1.5) + (2 << 20), 24 << 20), 48 << 20)

    cost = pl.CostEstimate(
        flops=2 * B_pad * (IN * H_pad + H_pad * O_pad),
        transcendentals=B_pad * H_pad,
        bytes_accessed=(B_pad * IN * x_itemsize + weight_bytes
                        + B_pad * O_pad * out_itemsize),
    )

    def _spec(shape, index_map, mode):
        if mode is None:
            return pl.BlockSpec(shape, index_map)
        return pl.BlockSpec(shape, index_map, pipeline_mode=mode)

    def build_call(single_buffer_weights):
        # Grid-invariant operands can be single-buffered (halves resident VMEM).
        res = pl.Buffered(1) if single_buffer_weights else None
        head = pl.Buffered(1) if (single_buffer_weights and n_o == 1) else None
        return pl.pallas_call(
            _multi_out_mlp_head_kernel,
            out_shape=jax.ShapeDtypeStruct((B_pad, O_pad), out_dtype),
            grid=grid,
            in_specs=[
                pl.BlockSpec((tile_b, IN), lambda i, j: (i, 0)),           # x: batch-tiled
                _spec((IN, H_pad), lambda i, j: (0, 0), res),              # W1' (BN folded)
                _spec((1, H_pad), lambda i, j: (0, 0), res),               # bn shift
                _spec((H_pad, tile_n), lambda i, j: (0, j), head),         # fused head W
                _spec((1, tile_n), lambda i, j: (0, j), head),             # fused head b
            ],
            out_specs=pl.BlockSpec((tile_b, tile_n), lambda i, j: (i, j)),
            scratch_shapes=[pltpu.VMEM((tile_b, H_pad), jnp.bfloat16)],
            compiler_params=pltpu.CompilerParams(
                dimension_semantics=("parallel", "arbitrary"),  # batch shards across TCs
                vmem_limit_bytes=vmem_limit,
            ),
            cost_estimate=cost,
        )

    try:
        out_slab = build_call(True)(x_p, w1_p, shift_p, wh_p, bh_p)
    except Exception:
        # pl.Buffered(1) is a VMEM-only optimization; fall back to default
        # double-buffering if this jax/libtpu build rejects pipeline_mode here.
        out_slab = build_call(False)(x_p, w1_p, shift_p, wh_p, bh_p)

    # Slice per-head outputs (drop batch padding and lane padding) in the wrapper.
    result = {}
    off = 0
    for k, o_dim in zip(names, out_dims):
        result[k] = out_slab[:B, off:off + o_dim]
        off += o_dim
    return result


def _init_linear(key, fan_in, fan_out, bias):
    """Deterministic PyTorch-style init: U(-1/sqrt(fan_in), 1/sqrt(fan_in))."""
    kw, kb = jax.random.split(key)
    bound = 1.0 / (fan_in ** 0.5)
    w = jax.random.uniform(kw, (fan_in, fan_out), jnp.float32, -bound, bound)
    if not bias:
        return w, None
    b = jax.random.uniform(kb, (1, fan_out), jnp.float32, -bound, bound)
    return w, b


def _reference(x, w1, bn_scale, bn_shift, head_params):
    """Pure-JAX reference emulating the kernel's bf16 matmul inputs (f32 accumulate)."""
    xb = x.astype(jnp.bfloat16).astype(jnp.float32)
    w1b = (w1 * bn_scale).astype(jnp.bfloat16).astype(jnp.float32)
    h = xb @ w1b + bn_shift
    h = h * jax.nn.sigmoid(h)
    hb = h.astype(jnp.bfloat16).astype(jnp.float32)
    out = {}
    for k, (w, b) in head_params.items():
        wb = w.astype(jnp.bfloat16).astype(jnp.float32)
        out[k] = hb @ wb + b
    return out


if __name__ == "__main__":
    # Small shapes consistent with the module's forward: x is (batch, in_features).
    # batch=64 exercises the multi-step batch grid (4 tiles of 16 rows).
    batch = 64
    in_features = 32
    hidden_features = 64
    out_features_dict = {"item_1": 4, "item_2": 10}

    key = jax.random.PRNGKey(0)
    k_x, k_w1, k_h1, k_h2 = jax.random.split(key, 4)

    x = jax.random.normal(k_x, (batch, in_features), jnp.float32)

    # layers[0]: Linear(in_features, hidden_features, bias=False)
    w1, _ = _init_linear(k_w1, in_features, hidden_features, bias=False)

    # layers[1]: BatchNorm1d(hidden_features) at init (inference mode):
    gamma = jnp.ones((1, hidden_features), jnp.float32)
    beta = jnp.zeros((1, hidden_features), jnp.float32)
    running_mean = jnp.zeros((1, hidden_features), jnp.float32)
    running_var = jnp.ones((1, hidden_features), jnp.float32)
    eps = 1e-5
    bn_scale = gamma / jnp.sqrt(running_var + eps)
    bn_shift = beta - running_mean * bn_scale

    # last_fc_dict: Linear(hidden_features, out_k, bias=True) per key.
    head_keys = {"item_1": k_h1, "item_2": k_h2}
    head_params = {
        name: _init_linear(head_keys[name], hidden_features, out_f, bias=True)
        for name, out_f in out_features_dict.items()
    }

    # Pack weights ONCE (hoisted out of the hot path), then run the fused kernel.
    packed = pack_mlp_head_params(w1, bn_scale, bn_shift, head_params)
    jax.block_until_ready(packed)

    y = multi_out_mlp_head(x, packed)
    jax.block_until_ready(y)

    y_ref = _reference(x, w1, bn_scale, bn_shift, head_params)
    for k in out_features_dict:
        assert y[k].shape == (batch, out_features_dict[k]), y[k].shape
        assert jnp.allclose(y[k], y_ref[k], atol=2e-3, rtol=2e-3), k

    print("KERNEL_OK")
</pallas_src>

<mosaic_0001>
module attributes {stable_mosaic.version = 11 : i64} {
  func.func @_multi_out_mlp_head_kernel(%arg0: i32, %arg1: i32, %arg2: memref<16x32xf32, #tpu.memory_space<vmem>>, %arg3: memref<32x128xbf16, #tpu.memory_space<vmem>>, %arg4: memref<1x128xf32, #tpu.memory_space<vmem>>, %arg5: memref<128x128xbf16, #tpu.memory_space<vmem>>, %arg6: memref<1x128xf32, #tpu.memory_space<vmem>>, %arg7: memref<16x128xf32, #tpu.memory_space<vmem>>, %arg8: memref<16x128xbf16, #tpu.memory_space<vmem>>) attributes {dimension_semantics = [#tpu.dimension_semantics<parallel>, #tpu.dimension_semantics<arbitrary>], iteration_bounds = array<i64: 4, 1>, scalar_prefetch = 0 : i64, scratch_operands = 1 : i64, tpu.core_type = #tpu.core_type<tc>, window_params = [{transform_indices = @transform_0, window_bounds = array<i64: 16, 32>}, {pipeline_mode = #tpu.pipeline_mode<synchronous>, transform_indices = @transform_1, window_bounds = array<i64: 32, 128>}, {pipeline_mode = #tpu.pipeline_mode<synchronous>, transform_indices = @transform_2, window_bounds = array<i64: 1, 128>}, {pipeline_mode = #tpu.pipeline_mode<synchronous>, transform_indices = @transform_3, window_bounds = array<i64: 128, 128>}, {pipeline_mode = #tpu.pipeline_mode<synchronous>, transform_indices = @transform_4, window_bounds = array<i64: 1, 128>}, {transform_indices = @transform_5, window_bounds = array<i64: 16, 128>}]} {
    %c0_i32 = arith.constant 0 : i32
    %0 = arith.cmpi eq, %arg1, %c0_i32 : i32
    %1 = arith.extui %0 : i1 to i32
    %c0_i32_0 = arith.constant 0 : i32
    %2 = arith.cmpi ne, %1, %c0_i32_0 : i32
    scf.if %2 {
      %c0_8 = arith.constant 0 : index
      %c0_9 = arith.constant 0 : index
      %10 = vector.load %arg2[%c0_8, %c0_9] : memref<16x32xf32, #tpu.memory_space<vmem>>, vector<16x32xf32>
      %11 = arith.truncf %10 : vector<16x32xf32> to vector<16x32xbf16>
      %c0_10 = arith.constant 0 : index
      %c0_11 = arith.constant 0 : index
      %12 = vector.load %arg3[%c0_10, %c0_11] : memref<32x128xbf16, #tpu.memory_space<vmem>>, vector<32x128xbf16>
      %cst_12 = arith.constant dense<0.000000e+00> : vector<16x128xf32>
      %13 = tpu.matmul %11, %12, %cst_12 {dimension_numbers = #tpu.dot_dimension_numbers<[1], [0], [0], [1], [0, 0, 1, 1], [], []>} : vector<16x32xbf16>, vector<32x128xbf16>, vector<16x128xf32> -> vector<16x128xf32>
      %c0_13 = arith.constant 0 : index
      %c0_14 = arith.constant 0 : index
      %14 = vector.load %arg4[%c0_13, %c0_14] : memref<1x128xf32, #tpu.memory_space<vmem>>, vector<1x128xf32>
      %15 = vector.broadcast %14 : vector<1x128xf32> to vector<16x128xf32>
      %16 = arith.addf %13, %15 : vector<16x128xf32>
      %17 = arith.negf %16 : vector<16x128xf32>
      %18 = math.exp %17 : vector<16x128xf32>
      %cst_15 = arith.constant 1.000000e+00 : f32
      %19 = vector.broadcast %cst_15 : f32 to vector<16x128xf32>
      %20 = arith.addf %19, %18 : vector<16x128xf32>
      %21 = arith.divf %19, %20 : vector<16x128xf32>
      %22 = arith.mulf %16, %21 : vector<16x128xf32>
      %23 = arith.truncf %22 : vector<16x128xf32> to vector<16x128xbf16>
      %c0_16 = arith.constant 0 : index
      %c0_17 = arith.constant 0 : index
      %24 = vector.load %arg8[%c0_16, %c0_17] : memref<16x128xbf16, #tpu.memory_space<vmem>>, vector<16x128xbf16>
      tpu.vector_store %arg8[%c0_16, %c0_17], %23 {strides = array<i32>} : memref<16x128xbf16, #tpu.memory_space<vmem>>, vector<16x128xbf16>,
    } else {
    }
    %c0 = arith.constant 0 : index
    %c0_1 = arith.constant 0 : index
    %3 = vector.load %arg8[%c0, %c0_1] : memref<16x128xbf16, #tpu.memory_space<vmem>>, vector<16x128xbf16>
    %c0_2 = arith.constant 0 : index
    %c0_3 = arith.constant 0 : index
    %4 = vector.load %arg5[%c0_2, %c0_3] : memref<128x128xbf16, #tpu.memory_space<vmem>>, vector<128x128xbf16>
    %cst = arith.constant dense<0.000000e+00> : vector<16x128xf32>
    %5 = tpu.matmul %3, %4, %cst {dimension_numbers = #tpu.dot_dimension_numbers<[1], [0], [0], [1], [0, 0, 1, 1], [], []>} : vector<16x128xbf16>, vector<128x128xbf16>, vector<16x128xf32> -> vector<16x128xf32>
    %c0_4 = arith.constant 0 : index
    %c0_5 = arith.constant 0 : index
    %6 = vector.load %arg6[%c0_4, %c0_5] : memref<1x128xf32, #tpu.memory_space<vmem>>, vector<1x128xf32>
    %7 = vector.broadcast %6 : vector<1x128xf32> to vector<16x128xf32>
    %8 = arith.addf %5, %7 : vector<16x128xf32>
    %c0_6 = arith.constant 0 : index
    %c0_7 = arith.constant 0 : index
    %9 = vector.load %arg7[%c0_6, %c0_7] : memref<16x128xf32, #tpu.memory_space<vmem>>, vector<16x128xf32>
    tpu.vector_store %arg7[%c0_6, %c0_7], %8 {strides = array<i32>} : memref<16x128xf32, #tpu.memory_space<vmem>>, vector<16x128xf32>,
    return
  }
  func.func @transform_0(%arg0: i32, %arg1: i32) -> (i32, i32) {
    %c0_i32 = arith.constant 0 : i32
    %c0_i32_0 = arith.constant 0 : i32
    return %arg0, %c0_i32 : i32, i32
  }
  func.func @transform_1(%arg0: i32, %arg1: i32) -> (i32, i32) {
    %c0_i32 = arith.constant 0 : i32
    %c0_i32_0 = arith.constant 0 : i32
    %c0_i32_1 = arith.constant 0 : i32
    return %c0_i32, %c0_i32_0 : i32, i32
  }
  func.func @transform_2(%arg0: i32, %arg1: i32) -> (i32, i32) {
    %c0_i32 = arith.constant 0 : i32
    %c0_i32_0 = arith.constant 0 : i32
    %c0_i32_1 = arith.constant 0 : i32
    return %c0_i32, %c0_i32_0 : i32, i32
  }
  func.func @transform_3(%arg0: i32, %arg1: i32) -> (i32, i32) {
    %c0_i32 = arith.constant 0 : i32
    %c0_i32_0 = arith.constant 0 : i32
    return %c0_i32, %arg1 : i32, i32
  }
  func.func @transform_4(%arg0: i32, %arg1: i32) -> (i32, i32) {
    %c0_i32 = arith.constant 0 : i32
    %c0_i32_0 = arith.constant 0 : i32
    return %c0_i32, %arg1 : i32, i32
  }
  func.func @transform_5(%arg0: i32, %arg1: i32) -> (i32, i32) {
    %c0_i32 = arith.constant 0 : i32
    return %arg0, %arg1 : i32, i32
  }
}

module attributes {stable_mosaic.version = 11 : i64} {
  func.func @_multi_out_mlp_head_kernel(%arg0: i32, %arg1: i32, %arg2: memref<16x32xf32, #tpu.memory_space<vmem>>, %arg3: memref<32x128xbf16, #tpu.memory_space<vmem>>, %arg4: memref<1x128xf32, #tpu.memory_space<vmem>>, %arg5: memref<128x128xbf16, #tpu.memory_space<vmem>>, %arg6: memref<1x128xf32, #tpu.memory_space<vmem>>, %arg7: memref<16x128xf32, #tpu.memory_space<vmem>>, %arg8: memref<16x128xbf16, #tpu.memory_space<vmem>>) attributes {dimension_semantics = [#tpu.dimension_semantics<parallel>, #tpu.dimension_semantics<arbitrary>], iteration_bounds = array<i64: 4, 1>, scalar_prefetch = 0 : i64, scratch_operands = 1 : i64, tpu.core_type = #tpu.core_type<tc>, window_params = [{transform_indices = @transform_0, window_bounds = array<i64: 16, 32>}, {pipeline_mode = #tpu.pipeline_mode<synchronous>, transform_indices = @transform_1, window_bounds = array<i64: 32, 128>}, {pipeline_mode = #tpu.pipeline_mode<synchronous>, transform_indices = @transform_2, window_bounds = array<i64: 1, 128>}, {transform_indices = @transform_3, window_bounds = array<i64: 128, 128>}, {transform_indices = @transform_4, window_bounds = array<i64: 1, 128>}, {transform_indices = @transform_5, window_bounds = array<i64: 16, 128>}]} {
    %c0_i32 = arith.constant 0 : i32
    %0 = arith.cmpi eq, %arg1, %c0_i32 : i32
    %1 = arith.extui %0 : i1 to i32
    %c0_i32_0 = arith.constant 0 : i32
    %2 = arith.cmpi ne, %1, %c0_i32_0 : i32
    scf.if %2 {
      %c0_8 = arith.constant 0 : index
      %c0_9 = arith.constant 0 : index
      %10 = vector.load %arg2[%c0_8, %c0_9] : memref<16x32xf32, #tpu.memory_space<vmem>>, vector<16x32xf32>
      %11 = arith.truncf %10 : vector<16x32xf32> to vector<16x32xbf16>
      %c0_10 = arith.constant 0 : index
      %c0_11 = arith.constant 0 : index
      %12 = vector.load %arg3[%c0_10, %c0_11] : memref<32x128xbf16, #tpu.memory_space<vmem>>, vector<32x128xbf16>
      %cst_12 = arith.constant dense<0.000000e+00> : vector<16x128xf32>
      %13 = tpu.matmul %11, %12, %cst_12 {dimension_numbers = #tpu.dot_dimension_numbers<[1], [0], [0], [1], [0, 0, 1, 1], [], []>} : vector<16x32xbf16>, vector<32x128xbf16>, vector<16x128xf32> -> vector<16x128xf32>
      %c0_13 = arith.constant 0 : index
      %c0_14 = arith.constant 0 : index
      %14 = vector.load %arg4[%c0_13, %c0_14] : memref<1x128xf32, #tpu.memory_space<vmem>>, vector<1x128xf32>
      %15 = vector.broadcast %14 : vector<1x128xf32> to vector<16x128xf32>
      %16 = arith.addf %13, %15 : vector<16x128xf32>
      %17 = arith.negf %16 : vector<16x128xf32>
      %18 = math.exp %17 : vector<16x128xf32>
      %cst_15 = arith.constant 1.000000e+00 : f32
      %19 = vector.broadcast %cst_15 : f32 to vector<16x128xf32>
      %20 = arith.addf %19, %18 : vector<16x128xf32>
      %21 = arith.divf %19, %20 : vector<16x128xf32>
      %22 = arith.mulf %16, %21 : vector<16x128xf32>
      %23 = arith.truncf %22 : vector<16x128xf32> to vector<16x128xbf16>
      %c0_16 = arith.constant 0 : index
      %c0_17 = arith.constant 0 : index
      %24 = vector.load %arg8[%c0_16, %c0_17] : memref<16x128xbf16, #tpu.memory_space<vmem>>, vector<16x128xbf16>
      tpu.vector_store %arg8[%c0_16, %c0_17], %23 {strides = array<i32>} : memref<16x128xbf16, #tpu.memory_space<vmem>>, vector<16x128xbf16>,
    } else {
    }
    %c0 = arith.constant 0 : index
    %c0_1 = arith.constant 0 : index
    %3 = vector.load %arg8[%c0, %c0_1] : memref<16x128xbf16, #tpu.memory_space<vmem>>, vector<16x128xbf16>
    %c0_2 = arith.constant 0 : index
    %c0_3 = arith.constant 0 : index
    %4 = vector.load %arg5[%c0_2, %c0_3] : memref<128x128xbf16, #tpu.memory_space<vmem>>, vector<128x128xbf16>
    %cst = arith.constant dense<0.000000e+00> : vector<16x128xf32>
    %5 = tpu.matmul %3, %4, %cst {dimension_numbers = #tpu.dot_dimension_numbers<[1], [0], [0], [1], [0, 0, 1, 1], [], []>} : vector<16x128xbf16>, vector<128x128xbf16>, vector<16x128xf32> -> vector<16x128xf32>
    %c0_4 = arith.constant 0 : index
    %c0_5 = arith.constant 0 : index
    %6 = vector.load %arg6[%c0_4, %c0_5] : memref<1x128xf32, #tpu.memory_space<vmem>>, vector<1x128xf32>
    %7 = vector.broadcast %6 : vector<1x128xf32> to vector<16x128xf32>
    %8 = arith.addf %5, %7 : vector<16x128xf32>
    %c0_6 = arith.constant 0 : index
    %c0_7 = arith.constant 0 : index
    %9 = vector.load %arg7[%c0_6, %c0_7] : memref<16x128xf32, #tpu.memory_space<vmem>>, vector<16x128xf32>
    tpu.vector_store %arg7[%c0_6, %c0_7], %8 {strides = array<i32>} : memref<16x128xf32, #tpu.memory_space<vmem>>, vector<16x128xf32>,
    return
  }
  func.func @transform_0(%arg0: i32, %arg1: i32) -> (i32, i32) {
    %c0_i32 = arith.constant 0 : i32
    %c0_i32_0 = arith.constant 0 : i32
    return %arg0, %c0_i32 : i32, i32
  }
  func.func @transform_1(%arg0: i32, %arg1: i32) -> (i32, i32) {
    %c0_i32 = arith.constant 0 : i32
    %c0_i32_0 = arith.constant 0 : i32
    %c0_i32_1 = arith.constant 0 : i32
    return %c0_i32, %c0_i32_0 : i32, i32
  }
  func.func @transform_2(%arg0: i32, %arg1: i32) -> (i32, i32) {
    %c0_i32 = arith.constant 0 : i32
    %c0_i32_0 = arith.constant 0 : i32
    %c0_i32_1 = arith.constant 0 : i32
    return %c0_i32, %c0_i32_0 : i32, i32
  }
  func.func @transform_3(%arg0: i32, %arg1: i32) -> (i32, i32) {
    %c0_i32 = arith.constant 0 : i32
    %c0_i32_0 = arith.constant 0 : i32
    return %c0_i32, %arg1 : i32, i32
  }
  func.func @transform_4(%arg0: i32, %arg1: i32) -> (i32, i32) {
    %c0_i32 = arith.constant 0 : i32
    %c0_i32_0 = arith.constant 0 : i32
    return %c0_i32, %arg1 : i32, i32
  }
  func.func @transform_5(%arg0: i32, %arg1: i32) -> (i32, i32) {
    %c0_i32 = arith.constant 0 : i32
    return %arg0, %arg1 : i32, i32
  }
}

</mosaic_0001>

<bundles_post_ra>
// kernel: tpu_custom_call.1
= control target key start
LH: loop header
LB: loop body
LE: loop exit
PB: predicated region body
PF: predicated region fallthrough
CT: control target
= control target key end

     0   :  { %10 = vsyncpa [#allocation4], 0  ;;  %s959_s0 = inlined_call_operand.vmem [shape: f32[64,32], index: 0, kind: input, shape index: {}]   ;;  %s960_s1 = inlined_call_operand.vmem [shape: bf16[32,128], index: 1, kind: input, shape index: {}]   ;;  %s961_s2 = inlined_call_operand.vmem [shape: f32[1,128], index: 2, kind: input, shape index: {}]   ;;  %s962_s3 = inlined_call_operand.vmem [shape: bf16[128,128], index: 3, kind: input, shape index: {}]   ;;  %s963_s4 = inlined_call_operand.vmem [shape: f32[1,128], index: 4, kind: input, shape index: {}]   ;;  %s964_s5 = inlined_call_operand.hbm [shape: f32[64,128], index: 5, kind: output, shape index: {}]  }
   0x1   :  { %12 = vsyncpa [#allocation4 + $0x1], 0  ;;  %s827_s18 = smov 0   ;;  %s829_s19 = smov 0  }
   0x2   :  { %s831_s20 = smov 0   ;;  %s833_s21 = smov 0  }
   0x3   :  { %s835_s22 = smov 0   ;;  %s837_s23 = smov 0  }
   0x4 LB: > { %s569_s24 = sadd.s32 4294967295, %s793_s23   ;;  %s570_s25 = sadd.s32 4294967294, %s793_s23   ;;  %s793_s23 = sphi %s837_s23, %s18_s23   ;;  %s789_s22 = sphi %s835_s22, %s971_s22   ;;  %s785_s21 = sphi %s833_s21, %s970_s21   ;;  %s781_s20 = sphi %s831_s20, %s969_s20   ;;  %s777_s19 = sphi %s829_s19, %s968_s19   ;;  %s773_s18 = sphi %s827_s18, %s967_s18  }
   0x5   : > { %s30_s26 = sadd.s32 1, %s789_s22  ;;  %s159_s27 = sadd.s32 1, %s781_s20 }
   0x6   : > { %p32_p0 = scmp.ge.s32.totalorder %s30_s26, 4  ;;  %p169_p1 = scmp.ne.s32.totalorder %s781_s20, %s777_s19 }
   0x7   : > { %p170_p2 = scmp.eq.s32.totalorder %s569_s24, 3  ;;  %p175_p3 = scmp.ne.s32.totalorder %s777_s19, %s773_s18 }
   0x8   : > { %s973_s26 = smov (%p32_p0, %s30_s26), 0  ;;  %p176_p5 = scmp.eq.s32.totalorder %s570_s25, 3 }
   0x9   : > { %p867_p4 = por %p170_p2, %p169_p1  ;;  %s154_s29 = ssub.s32 %s789_s22, %s973_s26 }
   0xa   : > { %p575_p6 = scmp.ge.s32.totalorder %s793_s23, 1  ;;  %p157_p7 = scmp.eq.s32.totalorder %s154_s29, 0 }
   0xb   : > { %p874_p8 = por %p176_p5, %p175_p3  ;;  %p222_p9 = scmp.lt.s32.totalorder %s793_s23, 5 }
   0xc   : > { %s880_s6 = scalar_select %p157_p7, %s781_s20, %s159_s27  }
   0xd   : > { %p223_p10 = pnand %p575_p6, %p222_p9 }
   0xe   : > { %s577_s9 = sshll.u32 (!%p223_p10), %s785_s21, 1  ;;  %s254_s25 = sand.u32 (!%p223_p10), 1, %s777_s19  }
   0xf   : > { %226 = sbr.rel (%p223_p10) target bundleno = 344 (0x158), region = 40  ;;  %p258_p11 = scmp.lt.s32.totalorder (!%p223_p10), %s577_s9, 7 }
  0x10   : > { %s576_s27 = sshll.u32 (!%p223_p10), %s254_s25, 4  ;;  %s642_s8 = sshll.u32 (!%p223_p10), %s785_s21, 4 }
  0x11   : > { %s466_s11 = scalar_lea.hbm (!%p223_p10), %s964_s5, %s642_s8 }
  0x12   : > { %s469_s14 = sshll.u32 (!%p223_p10), %s466_s11, 4  ;;  %s470_s14 = int_to_ptr.hbm [resolvable:$true] %s469_s14 }
  0x13   : > { %s729_s16 = sshra.s32 (!%p223_p10), %s470_s14, 4  ;;  %s730_s16 = int_to_ptr.hbm [resolvable:$true] %s729_s16 }
  0x14   : > { %v632_v0 = vld [vmem:[%s960_s1 + $0x8] sm:$0xff]  ;;  %v631_v1 = vld [vmem:[%s960_s1] sm:$0xff]  ;;  %s975_s9 = smov (!%p258_p11, %s577_s9), 7  ;;  %vm299_vm0 = vcmask 261120   ;;  %v641_v5 = vld [vmem:[%s962_s3 + $0x38] sm:$0xff]  ;;  %s731_s21 = scalar_lea.hbm %s730_s16, 16 }
  0x15   : > { %309 = vmatpush.bf16.msra.mxu0 %v632_v0  ;;  %s578_s12 = sshll.u32 %s975_s9, 3  ;;  %437 = vmatpush.bf16.msra.mxu1 %v641_v5  ;;  %v640_v6 = vld [vmem:[%s962_s3 + $0x30] sm:$0xff]  ;;  %v639_v7 = vld [vmem:[%s962_s3 + $0x28] sm:$0xff]  ;;  %v705_v8 = vld [vmem:[%s961_s2] ss:$0 sm:$0xff]  ;;  %p732_p12 = scmp.ne.s32.totalorder %s730_s16, %s731_s21 }
  0x16   : > { %s261_s15 = scalar_lea.vmem %s959_s0, %s578_s12  ;;  %v638_v9 = vld [vmem:[%s962_s3 + $0x20] sm:$0xff]  ;;  %v637_v13 = vld [vmem:[%s962_s3 + $0x18] sm:$0xff]  ;;  %v636_v14 = vld [vmem:[%s962_s3 + $0x10] sm:$0xff]  ;;  %s256_s12 = scalar_lea.vmem [#allocation3], %s576_s27 }
  0x17   : > { %v276_v2 = vld [vmem:[%s261_s15] sm:$0xff]  ;;  %v277_v3 = vld [vmem:[%s261_s15 + $0x8] sm:$0xff]  ;;  %s467_s13 = sshll.u32 %s256_s12, 4  ;;  %s454_s15 = scalar_lea.sflag [#allocation4], %s254_s25  ;;  %s468_s13 = int_to_ptr.vmem [resolvable:$true] %s467_s13 }
  0x18   : > { %v278_v4 = vpack.c.bf16 %v277_v3, %v276_v2  ;;  %v635_v19 = vld [vmem:[%s962_s3 + $0x8] sm:$0xff]  ;;  %v634_v21 = vld [vmem:[%s962_s3] sm:$0xff]  ;;  %p733_p13 = pnand %p732_p12, %p867_p4  ;;  %s735_s27 = scalar_lea.hbm %s964_s5, 64 }
  0x19   : > { %310 = vmatpush.bf16.msra.mxu0 %v631_v1  ;;  %438 = vmatpush.bf16.msra.mxu1 %v640_v6  ;;  %v706_v48 = vld [vmem:[%s963_s4] ss:$0 sm:$0xff]  ;;  %p736_p1 = scmp.lt.s32.totalorder %s730_s16, %s964_s5  ;;  %p737_p2 = scmp.lt.s32.totalorder %s735_s27, %s731_s21 }
  0x1a   : > { %p734_p0 = pneg %p733_p13 }
  0x1b   : > { %p738_p3 = por %p737_p2, %p736_p1 }
  0x1c   : > { %587 = vmatmul.msk.bf16.vlgmr.msra.gmra.mxu0 %vm299_vm0, %v278_v4 }
  0x1d   : > { %439 = vmatpush.bf16.msra.mxu1 %v639_v7  ;;  %p739_p5 = pnand %p738_p3, %p734_p0 }
  0x21   : > { %440 = vmatpush.bf16.msra.mxu1 %v638_v9 }
  0x25   : > { %441 = vmatpush.bf16.msra.mxu1 %v637_v13 }
  0x29   : > { %442 = vmatpush.bf16.msra.mxu1 %v636_v14 }
  0x2d   : > { %443 = vmatpush.bf16.msra.mxu1 %v635_v19 }
  0x31   : > { %444 = vmatpush.bf16.msra.mxu1 %v634_v21 }
  0x99   : > { %v312_v10 = vpop.f32.mrf.mxu0 }
  0x9a   : > { %v313_v11 = vadd.f32 %v705_v8, %v312_v10 }
  0x9c   : > { %v588_v12 = vmul.f32 -1.442695, %v313_v11 }
  0x9e   : > { %707 = vpow2.f32 %v588_v12 }
  0xa1   : > { %v314_v15 = vpop.f32.mrf.mxu0 }
  0xa2   : > { %v315_v16 = vadd.f32 %v705_v8, %v314_v15 }
  0xa4   : > { %v708_v17 = vpop.eup %707  ;;  %v589_v18 = vmul.f32 -1.442695, %v315_v16 }
  0xa5   : > { %v323_v20 = vadd.f32 1.0, %v708_v17 }
  0xa6   : > { %709 = vpow2.f32 %v589_v18 }
  0xa7   : > { %711 = vrcp.f32 %v323_v20  ;;  %v336_v31 = vand.u32 2147483648, %v323_v20  ;;  %vm330_vm2 = vweird.f32 %v323_v20  ;;  %v334_v32 = vand.u32 2147483647, %v323_v20 }
  0xa9   : > { %v337_v38 = vor.u32 1.1754944e-38, %v336_v31  ;;  %vm335_vm5 = vcmp.eq.f32.partialorder %v334_v32, 8.507059e+37 }
  0xac   : > { %v710_v22 = vpop.eup %709 }
  0xad   : > { %v712_v23 = vpop.eup %711  ;;  %v324_v24 = vadd.f32 1.0, %v710_v22 }
  0xae   : > { %v326_v25 = vmul.f32 %v712_v23, %v323_v20  ;;  %vm331_vm1 = vweird.f32 %v712_v23 }
  0xaf   : > { %713 = vrcp.f32 %v324_v24  ;;  %vm332_vm3 = vmor %vm330_vm2, %vm331_vm1  ;;  %v351_v34 = vand.u32 2147483648, %v324_v24  ;;  %v349_v37 = vand.u32 2147483647, %v324_v24  ;;  %vm345_vm6 = vweird.f32 %v324_v24 }
  0xb0   : > { %v327_v26 = vsub.f32 1.0, %v326_v25 }
  0xb1   : > { %v352_v41 = vor.u32 1.1754944e-38, %v351_v34  ;;  %vm350_vm8 = vcmp.eq.f32.partialorder %v349_v37, 8.507059e+37 }
  0xb2   : > { %v328_v27 = vmul.f32 %v712_v23, %v327_v26 }
  0xb4   : > { %v329_v29 = vadd.f32 %v712_v23, %v328_v27 }
  0xb5   : > { %v714_v28 = vpop.eup %713 }
  0xb6   : > { %v341_v30 = vmul.f32 %v714_v28, %v324_v24  ;;  %v333_v35 = vsel %vm332_vm3, %v712_v23, %v329_v29  ;;  %vm346_vm4 = vweird.f32 %v714_v28 }
  0xb7   : > { %v338_v40 = vsel %vm335_vm5, %v337_v38, %v333_v35  ;;  %vm347_vm7 = vmor %vm345_vm6, %vm346_vm4 }
  0xb8   : > { %v342_v33 = vsub.f32 1.0, %v341_v30  ;;  %v355_v44 = vmul.f32 %v338_v40, %v313_v11 }
  0xba   : > { %v343_v36 = vmul.f32 %v714_v28, %v342_v33 }
  0xbc   : > { %v344_v39 = vadd.f32 %v714_v28, %v343_v36 }
  0xbe   : > { %v348_v42 = vsel %vm347_vm7, %v714_v28, %v344_v39 }
  0xbf   : > { %v353_v43 = vsel %vm350_vm8, %v352_v41, %v348_v42 }
  0xc0   : > { %v356_v45 = vmul.f32 %v353_v43, %v315_v16 }
  0xc2   : > { %v646_v46 = vpack.c.bf16 %v356_v45, %v355_v44 }
  0xc4   : > { %647 = vst [vmem:[#allocation2] sm:$0xff] %v646_v46  }
  0xcb   : > { %v633_v47 = vld [vmem:[#allocation2] sm:$0xff] }
  0xcc   : > { %445 = vmatmul.bf16.vlgmr.msra.gmra.mxu1 %v633_v47 }
 0x149   : > { %v446_v49 = vpop.f32.mrf.mxu1 }
 0x14a   : > { %v447_v50 = vadd.f32 %v706_v48, %v446_v49 }
 0x14c   : > { %451 = vst [vmem:[%s256_s12] sm:$0xff] %v447_v50 }
 0x151   : > { %v448_v51 = vpop.f32.mrf.mxu1 }
 0x152   : > { %v449_v52 = vadd.f32 %v706_v48, %v448_v51 }
 0x154   : > { %452 = vst [vmem:[%s256_s12 + $0x8] sm:$0xff] %v449_v52 }
 0x155   : > { %742 = shalt.err (!%p739_p5)
}
 0x156   : > { %s795_s25 = smov 128   ;;  %s796_s8 = smov 8  }
 0x157   : > { %648 = dma.vmem_to_hbm [thread:$0]  (%p867_p4), %s468_s13, 256, %s470_s14, %s454_s15, %s795_s25, %s795_s25, %s796_s8  }
 0x158 PF: > { %p654_p6 = scmp.ge.s32.totalorder %s793_s23, 2  ;;  %s484_s9 = sand.u32 1, %s773_s18  }
 0x159   : > { %s485_s10 = scalar_lea.sflag [#allocation4], %s484_s9 }
 0x15a   : > { %p651_p7 = pnand %p654_p6, %p874_p8 }
 0x15c   : > { %p652_p9 = pneg %p651_p7 }
 0x15e   : > { %768 = dma.done.wait (%p652_p9), %s485_s10, 256  }
 0x15f   : > { %770 = vsyncadd (%p652_p9), %s485_s10, 4294967040  ;;  %s18_s23 = sadd.s32 1, %s793_s23   ;;  %s967_s18 = smov %s777_s19 }
 0x160   : > { %p15_p10 = scmp.ge.s32.totalorder %s18_s23, 6   ;;  %s968_s19 = smov %s781_s20 }
 0x161   : > { %s969_s20 = smov %s880_s6  ;;  %s970_s21 = smov %s789_s22 }
 0x162   : > { %s971_s22 = smov %s973_s26  ;;  %17 = sbr.rel (!%p15_p10) target bundleno = 4 (0x4), region = 85 }
 0x167   :  { %491 = vsyncpa [#allocation4], 1 }
 0x168   :  { %493 = vsyncpa [#allocation4 + $0x1], 1 }

// kernel: tpu_custom_call.1
= control target key start
LH: loop header
LB: loop body
LE: loop exit
PB: predicated region body
PF: predicated region fallthrough
CT: control target
= control target key end

     0   :  { %10 = vsyncpa [#allocation4], 0  ;;  %s959_s0 = inlined_call_operand.vmem [shape: f32[64,32], index: 0, kind: input, shape index: {}]   ;;  %s960_s1 = inlined_call_operand.vmem [shape: bf16[32,128], index: 1, kind: input, shape index: {}]   ;;  %s961_s2 = inlined_call_operand.vmem [shape: f32[1,128], index: 2, kind: input, shape index: {}]   ;;  %s962_s3 = inlined_call_operand.vmem [shape: bf16[128,128], index: 3, kind: input, shape index: {}]   ;;  %s963_s4 = inlined_call_operand.vmem [shape: f32[1,128], index: 4, kind: input, shape index: {}]   ;;  %s964_s5 = inlined_call_operand.hbm [shape: f32[64,128], index: 5, kind: output, shape index: {}]  }
   0x1   :  { %12 = vsyncpa [#allocation4 + $0x1], 0  ;;  %s827_s18 = smov 0   ;;  %s829_s19 = smov 0  }
   0x2   :  { %s831_s20 = smov 0   ;;  %s833_s21 = smov 0  }
   0x3   :  { %s835_s22 = smov 0   ;;  %s837_s23 = smov 0  }
   0x4 LB: > { %s569_s24 = sadd.s32 4294967295, %s793_s23   ;;  %s570_s25 = sadd.s32 4294967294, %s793_s23   ;;  %s793_s23 = sphi %s837_s23, %s18_s23   ;;  %s789_s22 = sphi %s835_s22, %s971_s22   ;;  %s785_s21 = sphi %s833_s21, %s970_s21   ;;  %s781_s20 = sphi %s831_s20, %s969_s20   ;;  %s777_s19 = sphi %s829_s19, %s968_s19   ;;  %s773_s18 = sphi %s827_s18, %s967_s18  }
   0x5   : > { %s30_s26 = sadd.s32 1, %s789_s22  ;;  %s159_s27 = sadd.s32 1, %s781_s20 }
   0x6   : > { %p32_p0 = scmp.ge.s32.totalorder %s30_s26, 4  ;;  %p169_p1 = scmp.ne.s32.totalorder %s781_s20, %s777_s19 }
   0x7   : > { %p170_p2 = scmp.eq.s32.totalorder %s569_s24, 3  ;;  %p175_p3 = scmp.ne.s32.totalorder %s777_s19, %s773_s18 }
   0x8   : > { %s973_s26 = smov (%p32_p0, %s30_s26), 0  ;;  %p176_p5 = scmp.eq.s32.totalorder %s570_s25, 3 }
   0x9   : > { %p867_p4 = por %p170_p2, %p169_p1  ;;  %s154_s29 = ssub.s32 %s789_s22, %s973_s26 }
   0xa   : > { %p575_p6 = scmp.ge.s32.totalorder %s793_s23, 1  ;;  %p157_p7 = scmp.eq.s32.totalorder %s154_s29, 0 }
   0xb   : > { %p874_p8 = por %p176_p5, %p175_p3  ;;  %p222_p9 = scmp.lt.s32.totalorder %s793_s23, 5 }
   0xc   : > { %s880_s6 = scalar_select %p157_p7, %s781_s20, %s159_s27  }
   0xd   : > { %p223_p10 = pnand %p575_p6, %p222_p9 }
   0xe   : > { %s577_s9 = sshll.u32 (!%p223_p10), %s785_s21, 1  ;;  %s254_s25 = sand.u32 (!%p223_p10), 1, %s777_s19  }
   0xf   : > { %226 = sbr.rel (%p223_p10) target bundleno = 344 (0x158), region = 40  ;;  %p258_p11 = scmp.lt.s32.totalorder (!%p223_p10), %s577_s9, 7 }
  0x10   : > { %s576_s27 = sshll.u32 (!%p223_p10), %s254_s25, 4  ;;  %s642_s8 = sshll.u32 (!%p223_p10), %s785_s21, 4 }
  0x11   : > { %s466_s11 = scalar_lea.hbm (!%p223_p10), %s964_s5, %s642_s8 }
  0x12   : > { %s469_s14 = sshll.u32 (!%p223_p10), %s466_s11, 4  ;;  %s470_s14 = int_to_ptr.hbm [resolvable:$true] %s469_s14 }
  0x13   : > { %s729_s16 = sshra.s32 (!%p223_p10), %s470_s14, 4  ;;  %s730_s16 = int_to_ptr.hbm [resolvable:$true] %s729_s16 }
  0x14   : > { %v632_v0 = vld [vmem:[%s960_s1 + $0x8] sm:$0xff]  ;;  %v631_v1 = vld [vmem:[%s960_s1] sm:$0xff]  ;;  %s975_s9 = smov (!%p258_p11, %s577_s9), 7  ;;  %vm299_vm0 = vcmask 261120   ;;  %v641_v5 = vld [vmem:[%s962_s3 + $0x38] sm:$0xff]  ;;  %s731_s21 = scalar_lea.hbm %s730_s16, 16 }
  0x15   : > { %309 = vmatpush.bf16.msra.mxu0 %v632_v0  ;;  %s578_s12 = sshll.u32 %s975_s9, 3  ;;  %437 = vmatpush.bf16.msra.mxu1 %v641_v5  ;;  %v640_v6 = vld [vmem:[%s962_s3 + $0x30] sm:$0xff]  ;;  %v639_v7 = vld [vmem:[%s962_s3 + $0x28] sm:$0xff]  ;;  %v705_v8 = vld [vmem:[%s961_s2] ss:$0 sm:$0xff]  ;;  %p732_p12 = scmp.ne.s32.totalorder %s730_s16, %s731_s21 }
  0x16   : > { %s261_s15 = scalar_lea.vmem %s959_s0, %s578_s12  ;;  %v638_v9 = vld [vmem:[%s962_s3 + $0x20] sm:$0xff]  ;;  %v637_v13 = vld [vmem:[%s962_s3 + $0x18] sm:$0xff]  ;;  %v636_v14 = vld [vmem:[%s962_s3 + $0x10] sm:$0xff]  ;;  %s256_s12 = scalar_lea.vmem [#allocation3], %s576_s27 }
  0x17   : > { %v276_v2 = vld [vmem:[%s261_s15] sm:$0xff]  ;;  %v277_v3 = vld [vmem:[%s261_s15 + $0x8] sm:$0xff]  ;;  %s467_s13 = sshll.u32 %s256_s12, 4  ;;  %s454_s15 = scalar_lea.sflag [#allocation4], %s254_s25  ;;  %s468_s13 = int_to_ptr.vmem [resolvable:$true] %s467_s13 }
  0x18   : > { %v278_v4 = vpack.c.bf16 %v277_v3, %v276_v2  ;;  %v635_v19 = vld [vmem:[%s962_s3 + $0x8] sm:$0xff]  ;;  %v634_v21 = vld [vmem:[%s962_s3] sm:$0xff]  ;;  %p733_p13 = pnand %p732_p12, %p867_p4  ;;  %s735_s27 = scalar_lea.hbm %s964_s5, 64 }
  0x19   : > { %310 = vmatpush.bf16.msra.mxu0 %v631_v1  ;;  %438 = vmatpush.bf16.msra.mxu1 %v640_v6  ;;  %v706_v48 = vld [vmem:[%s963_s4] ss:$0 sm:$0xff]  ;;  %p736_p1 = scmp.lt.s32.totalorder %s730_s16, %s964_s5  ;;  %p737_p2 = scmp.lt.s32.totalorder %s735_s27, %s731_s21 }
  0x1a   : > { %p734_p0 = pneg %p733_p13 }
  0x1b   : > { %p738_p3 = por %p737_p2, %p736_p1 }
  0x1c   : > { %587 = vmatmul.msk.bf16.vlgmr.msra.gmra.mxu0 %vm299_vm0, %v278_v4 }
  0x1d   : > { %439 = vmatpush.bf16.msra.mxu1 %v639_v7  ;;  %p739_p5 = pnand %p738_p3, %p734_p0 }
  0x21   : > { %440 = vmatpush.bf16.msra.mxu1 %v638_v9 }
  0x25   : > { %441 = vmatpush.bf16.msra.mxu1 %v637_v13 }
  0x29   : > { %442 = vmatpush.bf16.msra.mxu1 %v636_v14 }
  0x2d   : > { %443 = vmatpush.bf16.msra.mxu1 %v635_v19 }
  0x31   : > { %444 = vmatpush.bf16.msra.mxu1 %v634_v21 }
  0x99   : > { %v312_v10 = vpop.f32.mrf.mxu0 }
  0x9a   : > { %v313_v11 = vadd.f32 %v705_v8, %v312_v10 }
  0x9c   : > { %v588_v12 = vmul.f32 -1.442695, %v313_v11 }
  0x9e   : > { %707 = vpow2.f32 %v588_v12 }
  0xa1   : > { %v314_v15 = vpop.f32.mrf.mxu0 }
  0xa2   : > { %v315_v16 = vadd.f32 %v705_v8, %v314_v15 }
  0xa4   : > { %v708_v17 = vpop.eup %707  ;;  %v589_v18 = vmul.f32 -1.442695, %v315_v16 }
  0xa5   : > { %v323_v20 = vadd.f32 1.0, %v708_v17 }
  0xa6   : > { %709 = vpow2.f32 %v589_v18 }
  0xa7   : > { %711 = vrcp.f32 %v323_v20  ;;  %v336_v31 = vand.u32 2147483648, %v323_v20  ;;  %vm330_vm2 = vweird.f32 %v323_v20  ;;  %v334_v32 = vand.u32 2147483647, %v323_v20 }
  0xa9   : > { %v337_v38 = vor.u32 1.1754944e-38, %v336_v31  ;;  %vm335_vm5 = vcmp.eq.f32.partialorder %v334_v32, 8.507059e+37 }
  0xac   : > { %v710_v22 = vpop.eup %709 }
  0xad   : > { %v712_v23 = vpop.eup %711  ;;  %v324_v24 = vadd.f32 1.0, %v710_v22 }
  0xae   : > { %v326_v25 = vmul.f32 %v712_v23, %v323_v20  ;;  %vm331_vm1 = vweird.f32 %v712_v23 }
  0xaf   : > { %713 = vrcp.f32 %v324_v24  ;;  %vm332_vm3 = vmor %vm330_vm2, %vm331_vm1  ;;  %v351_v34 = vand.u32 2147483648, %v324_v24  ;;  %v349_v37 = vand.u32 2147483647, %v324_v24  ;;  %vm345_vm6 = vweird.f32 %v324_v24 }
  0xb0   : > { %v327_v26 = vsub.f32 1.0, %v326_v25 }
  0xb1   : > { %v352_v41 = vor.u32 1.1754944e-38, %v351_v34  ;;  %vm350_vm8 = vcmp.eq.f32.partialorder %v349_v37, 8.507059e+37 }
  0xb2   : > { %v328_v27 = vmul.f32 %v712_v23, %v327_v26 }
  0xb4   : > { %v329_v29 = vadd.f32 %v712_v23, %v328_v27 }
  0xb5   : > { %v714_v28 = vpop.eup %713 }
  0xb6   : > { %v341_v30 = vmul.f32 %v714_v28, %v324_v24  ;;  %v333_v35 = vsel %vm332_vm3, %v712_v23, %v329_v29  ;;  %vm346_vm4 = vweird.f32 %v714_v28 }
  0xb7   : > { %v338_v40 = vsel %vm335_vm5, %v337_v38, %v333_v35  ;;  %vm347_vm7 = vmor %vm345_vm6, %vm346_vm4 }
  0xb8   : > { %v342_v33 = vsub.f32 1.0, %v341_v30  ;;  %v355_v44 = vmul.f32 %v338_v40, %v313_v11 }
  0xba   : > { %v343_v36 = vmul.f32 %v714_v28, %v342_v33 }
  0xbc   : > { %v344_v39 = vadd.f32 %v714_v28, %v343_v36 }
  0xbe   : > { %v348_v42 = vsel %vm347_vm7, %v714_v28, %v344_v39 }
  0xbf   : > { %v353_v43 = vsel %vm350_vm8, %v352_v41, %v348_v42 }
  0xc0   : > { %v356_v45 = vmul.f32 %v353_v43, %v315_v16 }
  0xc2   : > { %v646_v46 = vpack.c.bf16 %v356_v45, %v355_v44 }
  0xc4   : > { %647 = vst [vmem:[#allocation2] sm:$0xff] %v646_v46  }
  0xcb   : > { %v633_v47 = vld [vmem:[#allocation2] sm:$0xff] }
  0xcc   : > { %445 = vmatmul.bf16.vlgmr.msra.gmra.mxu1 %v633_v47 }
 0x149   : > { %v446_v49 = vpop.f32.mrf.mxu1 }
 0x14a   : > { %v447_v50 = vadd.f32 %v706_v48, %v446_v49 }
 0x14c   : > { %451 = vst [vmem:[%s256_s12] sm:$0xff] %v447_v50 }
 0x151   : > { %v448_v51 = vpop.f32.mrf.mxu1 }
 0x152   : > { %v449_v52 = vadd.f32 %v706_v48, %v448_v51 }
 0x154   : > { %452 = vst [vmem:[%s256_s12 + $0x8] sm:$0xff] %v449_v52 }
 0x155   : > { %742 = shalt.err (!%p739_p5)
}
 0x156   : > { %s795_s25 = smov 128   ;;  %s796_s8 = smov 8  }
 0x157   : > { %648 = dma.vmem_to_hbm [thread:$0]  (%p867_p4), %s468_s13, 256, %s470_s14, %s454_s15, %s795_s25, %s795_s25, %s796_s8  }
 0x158 PF: > { %p654_p6 = scmp.ge.s32.totalorder %s793_s23, 2  ;;  %s484_s9 = sand.u32 1, %s773_s18  }
 0x159   : > { %s485_s10 = scalar_lea.sflag [#allocation4], %s484_s9 }
 0x15a   : > { %p651_p7 = pnand %p654_p6, %p874_p8 }
 0x15c   : > { %p652_p9 = pneg %p651_p7 }
 0x15e   : > { %768 = dma.done.wait (%p652_p9), %s485_s10, 256  }
 0x15f   : > { %770 = vsyncadd (%p652_p9), %s485_s10, 4294967040  ;;  %s18_s23 = sadd.s32 1, %s793_s23   ;;  %s967_s18 = smov %s777_s19 }
 0x160   : > { %p15_p10 = scmp.ge.s32.totalorder %s18_s23, 6   ;;  %s968_s19 = smov %s781_s20 }
 0x161   : > { %s969_s20 = smov %s880_s6  ;;  %s970_s21 = smov %s789_s22 }
 0x162   : > { %s971_s22 = smov %s973_s26  ;;  %17 = sbr.rel (!%p15_p10) target bundleno = 4 (0x4), region = 85 }
 0x167   :  { %491 = vsyncpa [#allocation4], 1 }
 0x168   :  { %493 = vsyncpa [#allocation4 + $0x1], 1 }

</bundles_post_ra>
